<compile_context>
chip_gen: v7x
topology: tpu7x:2x2x1
jax: 0.10.0
libtpu: 0.0.40
codegen_flags: <defaults>
</compile_context>

<pallas_src>
import functools

import jax
import jax.numpy as jnp
from jax.experimental import pallas as pl
from jax.experimental.pallas import tpu as pltpu


def _conv1x1_hardsig_kernel(w_ref, b_ref, x_ref, o_ref, *, h, w, hp, wp):
    # w_ref: VMEM (C_out, C_in) f32     b_ref: VMEM (C_out, 1) f32
    # x_ref: VMEM (BN, C_in, H*W)       o_ref: VMEM (BN, C_out, Hp*Wp)
    bn, c_in, p_in = x_ref.shape
    c_out, p_out = o_ref.shape[1], o_ref.shape[2]
    inv6 = jnp.float32(1.0 / 6.0)

    wm = w_ref[...].astype(jnp.float32)                 # (C_out, C_in)
    bcol = b_ref[...].astype(jnp.float32)               # (C_out, 1)
    border = jnp.clip(bcol, 0.0, 6.0) * inv6            # value of every padded pixel

    for s in range(bn):                                 # small static loop (unrolled)
        x = x_ref[s].astype(jnp.float32)                # (C_in, H*W), lane-dense
        # Sublane axis = C_out, lane axis = pixel: C_in full-vreg FMAs per tile.
        acc = bcol + wm[:, 0:1] * jnp.broadcast_to(x[0:1, :], (c_out, p_in))
        for c in range(1, c_in):
            acc = acc + wm[:, c:c + 1] * jnp.broadcast_to(x[c:c + 1, :], (c_out, p_in))
        v = (jnp.clip(acc, 0.0, 6.0) * inv6).astype(o_ref.dtype)   # (C_out, H*W)

        # 1x1 kernel + zero padding => every border output is clamp(bias,0,6)/6.
        # Fill the whole padded block with that constant (dense store), then
        # overwrite the interior W pixels of each of the H padded rows.
        o_ref[s] = jnp.broadcast_to(border, (c_out, p_out)).astype(o_ref.dtype)
        for r in range(h):
            dst = (r + 1) * wp + 1                      # static lane offset
            o_ref[s, :, dst:dst + w] = v[:, r * w:(r + 1) * w]


def model_forward(x, weight, bias, *, samples_per_step=4):
    """Conv2d(3, 8, 1, stride=1, padding=1) -> clamp(0, 6) -> / 6  (NCHW)."""
    n, c_in, h, w = x.shape
    c_out = weight.shape[0]
    hp, wp = h + 2, w + 2
    p_in, p_out = h * w, hp * wp

    bn = min(samples_per_step, n)
    # Keep every grid step a full block; pad the batch if it does not divide
    # evenly (padded samples are dropped afterwards; unused at the demo size).
    n_pad = (-n) % bn
    xr = x.reshape(n, c_in, p_in)            # merges trailing dims only: free
    if n_pad:
        xr = jnp.concatenate(
            [xr, jnp.zeros((n_pad, c_in, p_in), xr.dtype)], axis=0)
    nb = xr.shape[0]

    w2d = weight.reshape(c_out, c_in).astype(jnp.float32)   # 24 floats
    bcol = bias.reshape(c_out, 1).astype(jnp.float32)       # 8 floats

    kernel = functools.partial(_conv1x1_hardsig_kernel, h=h, w=w, hp=hp, wp=wp)

    out = pl.pallas_call(
        kernel,
        out_shape=jax.ShapeDtypeStruct((nb, c_out, p_out), x.dtype),
        grid=(nb // bn,),
        in_specs=[
            pl.BlockSpec((c_out, c_in), lambda i: (0, 0)),       # weights
            pl.BlockSpec((c_out, 1), lambda i: (0, 0)),           # bias
            pl.BlockSpec((bn, c_in, p_in), lambda i: (i, 0, 0)),  # pixels
        ],
        out_specs=pl.BlockSpec((bn, c_out, p_out), lambda i: (i, 0, 0)),
        compiler_params=pltpu.CompilerParams(
            dimension_semantics=("parallel",)),
    )(w2d, bcol, xr)

    if n_pad:
        out = out[:n]
    # Split the trailing dim back to (Hp, Wp): free reshape, output stays NCHW.
    return out.reshape(n, c_out, hp, wp)


if __name__ == "__main__":
    key = jax.random.PRNGKey(0)
    k_x, k_w, k_b = jax.random.split(key, 3)

    # Small shapes consistent with the module: batch=2, C_in=3, spatial=16.
    x = jax.random.normal(k_x, (2, 3, 16, 16), dtype=jnp.float32)
    weight = jax.random.normal(k_w, (8, 3, 1, 1), dtype=jnp.float32) * 0.1
    bias = jax.random.normal(k_b, (8,), dtype=jnp.float32) * 0.1

    y = model_forward(x, weight, bias)
    jax.block_until_ready(y)

    # Plain-JAX reference check (conv with zero padding -> clamp -> /6).
    xp = jnp.pad(x, ((0, 0), (0, 0), (1, 1), (1, 1)))
    ref = jnp.einsum("nchw,oc->nohw", xp, weight.reshape(8, 3)) + bias.reshape(1, 8, 1, 1)
    ref = jnp.clip(ref, 0.0, 6.0) / 6.0
    assert y.shape == (2, 8, 18, 18)
    assert jnp.allclose(y, ref, atol=1e-5, rtol=1e-5)

    print("KERNEL_OK")
</pallas_src>

<mosaic_0001>
module attributes {stable_mosaic.version = 11 : i64} {
  func.func @_conv1x1_hardsig_kernel(%arg0: i32, %arg1: memref<8x3xf32, #tpu.memory_space<vmem>>, %arg2: memref<8x1xf32, #tpu.memory_space<vmem>>, %arg3: memref<2x3x256xf32, #tpu.memory_space<vmem>>, %arg4: memref<2x8x324xf32, #tpu.memory_space<vmem>>) attributes {dimension_semantics = [#tpu.dimension_semantics<parallel>], iteration_bounds = array<i64: 1>, scalar_prefetch = 0 : i64, scratch_operands = 0 : i64, tpu.core_type = #tpu.core_type<tc>, window_params = [{pipeline_mode = #tpu.pipeline_mode<synchronous>, transform_indices = @transform_0, window_bounds = array<i64: 8, 3>}, {pipeline_mode = #tpu.pipeline_mode<synchronous>, transform_indices = @transform_1, window_bounds = array<i64: 8, 1>}, {transform_indices = @transform_2, window_bounds = array<i64: 2, 3, 256>}, {transform_indices = @transform_3, window_bounds = array<i64: 2, 8, 324>}]} {
    %c0 = arith.constant 0 : index
    %c0_0 = arith.constant 0 : index
    %0 = vector.load %arg1[%c0, %c0_0] : memref<8x3xf32, #tpu.memory_space<vmem>>, vector<8x3xf32>
    %c0_1 = arith.constant 0 : index
    %c0_2 = arith.constant 0 : index
    %1 = vector.load %arg2[%c0_1, %c0_2] : memref<8x1xf32, #tpu.memory_space<vmem>>, vector<8x1xf32>
    %cst = arith.constant 0.000000e+00 : f32
    %cst_3 = arith.constant 6.000000e+00 : f32
    %2 = vector.broadcast %cst : f32 to vector<8x1xf32>
    %3 = arith.maximumf %2, %1 : vector<8x1xf32>
    %4 = vector.broadcast %cst_3 : f32 to vector<8x1xf32>
    %5 = arith.minimumf %4, %3 : vector<8x1xf32>
    %cst_4 = arith.constant 0.166666672 : f32
    %6 = vector.broadcast %cst_4 : f32 to vector<8x1xf32>
    %7 = arith.mulf %5, %6 : vector<8x1xf32>
    %c0_5 = arith.constant 0 : index
    %c0_6 = arith.constant 0 : index
    %c0_7 = arith.constant 0 : index
    %8 = vector.load %arg3[%c0_5, %c0_6, %c0_7] : memref<2x3x256xf32, #tpu.memory_space<vmem>>, vector<1x3x256xf32>
    %9 = vector.shape_cast %8 : vector<1x3x256xf32> to vector<3x256xf32>
    %10 = vector.extract_strided_slice %0 {offsets = [0, 0], sizes = [8, 1], strides = [1, 1]} : vector<8x3xf32> to vector<8x1xf32>
    %11 = vector.extract_strided_slice %9 {offsets = [0, 0], sizes = [1, 256], strides = [1, 1]} : vector<3x256xf32> to vector<1x256xf32>
    %12 = vector.shape_cast %11 : vector<1x256xf32> to vector<1x256xf32>
    %13 = vector.broadcast %12 : vector<1x256xf32> to vector<8x256xf32>
    %14 = vector.broadcast %10 : vector<8x1xf32> to vector<8x256xf32>
    %15 = arith.mulf %14, %13 : vector<8x256xf32>
    %16 = vector.broadcast %1 : vector<8x1xf32> to vector<8x256xf32>
    %17 = arith.addf %16, %15 : vector<8x256xf32>
    %18 = vector.extract_strided_slice %0 {offsets = [0, 1], sizes = [8, 1], strides = [1, 1]} : vector<8x3xf32> to vector<8x1xf32>
    %19 = vector.extract_strided_slice %9 {offsets = [1, 0], sizes = [1, 256], strides = [1, 1]} : vector<3x256xf32> to vector<1x256xf32>
    %20 = vector.shape_cast %19 : vector<1x256xf32> to vector<1x256xf32>
    %21 = vector.broadcast %20 : vector<1x256xf32> to vector<8x256xf32>
    %22 = vector.broadcast %18 : vector<8x1xf32> to vector<8x256xf32>
    %23 = arith.mulf %22, %21 : vector<8x256xf32>
    %24 = arith.addf %17, %23 : vector<8x256xf32>
    %25 = vector.extract_strided_slice %0 {offsets = [0, 2], sizes = [8, 1], strides = [1, 1]} : vector<8x3xf32> to vector<8x1xf32>
    %26 = vector.extract_strided_slice %9 {offsets = [2, 0], sizes = [1, 256], strides = [1, 1]} : vector<3x256xf32> to vector<1x256xf32>
    %27 = vector.shape_cast %26 : vector<1x256xf32> to vector<1x256xf32>
    %28 = vector.broadcast %27 : vector<1x256xf32> to vector<8x256xf32>
    %29 = vector.broadcast %25 : vector<8x1xf32> to vector<8x256xf32>
    %30 = arith.mulf %29, %28 : vector<8x256xf32>
    %31 = arith.addf %24, %30 : vector<8x256xf32>
    %cst_8 = arith.constant 0.000000e+00 : f32
    %cst_9 = arith.constant 6.000000e+00 : f32
    %32 = vector.broadcast %cst_8 : f32 to vector<8x256xf32>
    %33 = arith.maximumf %32, %31 : vector<8x256xf32>
    %34 = vector.broadcast %cst_9 : f32 to vector<8x256xf32>
    %35 = arith.minimumf %34, %33 : vector<8x256xf32>
    %cst_10 = arith.constant 0.166666672 : f32
    %36 = vector.broadcast %cst_10 : f32 to vector<8x256xf32>
    %37 = arith.mulf %35, %36 : vector<8x256xf32>
    %38 = vector.shape_cast %7 : vector<8x1xf32> to vector<8x1xf32>
    %39 = vector.broadcast %38 : vector<8x1xf32> to vector<8x324xf32>
    %c0_11 = arith.constant 0 : index
    %c0_12 = arith.constant 0 : index
    %c0_13 = arith.constant 0 : index
    %40 = vector.load %arg4[%c0_11, %c0_12, %c0_13] : memref<2x8x324xf32, #tpu.memory_space<vmem>>, vector<1x8x324xf32>
    %41 = vector.shape_cast %40 : vector<1x8x324xf32> to vector<8x324xf32>
    %42 = vector.shape_cast %39 : vector<8x324xf32> to vector<1x8x324xf32>
    tpu.vector_store %arg4[%c0_11, %c0_12, %c0_13], %42 {strides = array<i32>} : memref<2x8x324xf32, #tpu.memory_space<vmem>>, vector<1x8x324xf32>,
    %43 = vector.extract_strided_slice %37 {offsets = [0, 0], sizes = [8, 16], strides = [1, 1]} : vector<8x256xf32> to vector<8x16xf32>
    %c0_14 = arith.constant 0 : index
    %c0_15 = arith.constant 0 : index
    %c19 = arith.constant 19 : index
    %44 = vector.load %arg4[%c0_14, %c0_15, %c19] : memref<2x8x324xf32, #tpu.memory_space<vmem>>, vector<1x8x16xf32>
    %45 = vector.shape_cast %44 : vector<1x8x16xf32> to vector<8x16xf32>
    %46 = vector.shape_cast %43 : vector<8x16xf32> to vector<1x8x16xf32>
    tpu.vector_store %arg4[%c0_14, %c0_15, %c19], %46 {strides = array<i32>} : memref<2x8x324xf32, #tpu.memory_space<vmem>>, vector<1x8x16xf32>,
    %47 = vector.extract_strided_slice %37 {offsets = [0, 16], sizes = [8, 16], strides = [1, 1]} : vector<8x256xf32> to vector<8x16xf32>
    %c0_16 = arith.constant 0 : index
    %c0_17 = arith.constant 0 : index
    %c37 = arith.constant 37 : index
    %48 = vector.load %arg4[%c0_16, %c0_17, %c37] : memref<2x8x324xf32, #tpu.memory_space<vmem>>, vector<1x8x16xf32>
    %49 = vector.shape_cast %48 : vector<1x8x16xf32> to vector<8x16xf32>
    %50 = vector.shape_cast %47 : vector<8x16xf32> to vector<1x8x16xf32>
    tpu.vector_store %arg4[%c0_16, %c0_17, %c37], %50 {strides = array<i32>} : memref<2x8x324xf32, #tpu.memory_space<vmem>>, vector<1x8x16xf32>,
    %51 = vector.extract_strided_slice %37 {offsets = [0, 32], sizes = [8, 16], strides = [1, 1]} : vector<8x256xf32> to vector<8x16xf32>
    %c0_18 = arith.constant 0 : index
    %c0_19 = arith.constant 0 : index
    %c55 = arith.constant 55 : index
    %52 = vector.load %arg4[%c0_18, %c0_19, %c55] : memref<2x8x324xf32, #tpu.memory_space<vmem>>, vector<1x8x16xf32>
    %53 = vector.shape_cast %52 : vector<1x8x16xf32> to vector<8x16xf32>
    %54 = vector.shape_cast %51 : vector<8x16xf32> to vector<1x8x16xf32>
    tpu.vector_store %arg4[%c0_18, %c0_19, %c55], %54 {strides = array<i32>} : memref<2x8x324xf32, #tpu.memory_space<vmem>>, vector<1x8x16xf32>,
    %55 = vector.extract_strided_slice %37 {offsets = [0, 48], sizes = [8, 16], strides = [1, 1]} : vector<8x256xf32> to vector<8x16xf32>
    %c0_20 = arith.constant 0 : index
    %c0_21 = arith.constant 0 : index
    %c73 = arith.constant 73 : index
    %56 = vector.load %arg4[%c0_20, %c0_21, %c73] : memref<2x8x324xf32, #tpu.memory_space<vmem>>, vector<1x8x16xf32>
    %57 = vector.shape_cast %56 : vector<1x8x16xf32> to vector<8x16xf32>
    %58 = vector.shape_cast %55 : vector<8x16xf32> to vector<1x8x16xf32>
    tpu.vector_store %arg4[%c0_20, %c0_21, %c73], %58 {strides = array<i32>} : memref<2x8x324xf32, #tpu.memory_space<vmem>>, vector<1x8x16xf32>,
    %59 = vector.extract_strided_slice %37 {offsets = [0, 64], sizes = [8, 16], strides = [1, 1]} : vector<8x256xf32> to vector<8x16xf32>
    %c0_22 = arith.constant 0 : index
    %c0_23 = arith.constant 0 : index
    %c91 = arith.constant 91 : index
    %60 = vector.load %arg4[%c0_22, %c0_23, %c91] : memref<2x8x324xf32, #tpu.memory_space<vmem>>, vector<1x8x16xf32>
    %61 = vector.shape_cast %60 : vector<1x8x16xf32> to vector<8x16xf32>
    %62 = vector.shape_cast %59 : vector<8x16xf32> to vector<1x8x16xf32>
    tpu.vector_store %arg4[%c0_22, %c0_23, %c91], %62 {strides = array<i32>} : memref<2x8x324xf32, #tpu.memory_space<vmem>>, vector<1x8x16xf32>,
    %63 = vector.extract_strided_slice %37 {offsets = [0, 80], sizes = [8, 16], strides = [1, 1]} : vector<8x256xf32> to vector<8x16xf32>
    %c0_24 = arith.constant 0 : index
    %c0_25 = arith.constant 0 : index
    %c109 = arith.constant 109 : index
    %64 = vector.load %arg4[%c0_24, %c0_25, %c109] : memref<2x8x324xf32, #tpu.memory_space<vmem>>, vector<1x8x16xf32>
    %65 = vector.shape_cast %64 : vector<1x8x16xf32> to vector<8x16xf32>
    %66 = vector.shape_cast %63 : vector<8x16xf32> to vector<1x8x16xf32>
    tpu.vector_store %arg4[%c0_24, %c0_25, %c109], %66 {strides = array<i32>} : memref<2x8x324xf32, #tpu.memory_space<vmem>>, vector<1x8x16xf32>,
    %67 = vector.extract_strided_slice %37 {offsets = [0, 96], sizes = [8, 16], strides = [1, 1]} : vector<8x256xf32> to vector<8x16xf32>
    %c0_26 = arith.constant 0 : index
    %c0_27 = arith.constant 0 : index
    %c127 = arith.constant 127 : index
    %68 = vector.load %arg4[%c0_26, %c0_27, %c127] : memref<2x8x324xf32, #tpu.memory_space<vmem>>, vector<1x8x16xf32>
    %69 = vector.shape_cast %68 : vector<1x8x16xf32> to vector<8x16xf32>
    %70 = vector.shape_cast %67 : vector<8x16xf32> to vector<1x8x16xf32>
    tpu.vector_store %arg4[%c0_26, %c0_27, %c127], %70 {strides = array<i32>} : memref<2x8x324xf32, #tpu.memory_space<vmem>>, vector<1x8x16xf32>,
    %71 = vector.extract_strided_slice %37 {offsets = [0, 112], sizes = [8, 16], strides = [1, 1]} : vector<8x256xf32> to vector<8x16xf32>
    %c0_28 = arith.constant 0 : index
    %c0_29 = arith.constant 0 : index
    %c145 = arith.constant 145 : index
    %72 = vector.load %arg4[%c0_28, %c0_29, %c145] : memref<2x8x324xf32, #tpu.memory_space<vmem>>, vector<1x8x16xf32>
    %73 = vector.shape_cast %72 : vector<1x8x16xf32> to vector<8x16xf32>
    %74 = vector.shape_cast %71 : vector<8x16xf32> to vector<1x8x16xf32>
    tpu.vector_store %arg4[%c0_28, %c0_29, %c145], %74 {strides = array<i32>} : memref<2x8x324xf32, #tpu.memory_space<vmem>>, vector<1x8x16xf32>,
    %75 = vector.extract_strided_slice %37 {offsets = [0, 128], sizes = [8, 16], strides = [1, 1]} : vector<8x256xf32> to vector<8x16xf32>
    %c0_30 = arith.constant 0 : index
    %c0_31 = arith.constant 0 : index
    %c163 = arith.constant 163 : index
    %76 = vector.load %arg4[%c0_30, %c0_31, %c163] : memref<2x8x324xf32, #tpu.memory_space<vmem>>, vector<1x8x16xf32>
    %77 = vector.shape_cast %76 : vector<1x8x16xf32> to vector<8x16xf32>
    %78 = vector.shape_cast %75 : vector<8x16xf32> to vector<1x8x16xf32>
    tpu.vector_store %arg4[%c0_30, %c0_31, %c163], %78 {strides = array<i32>} : memref<2x8x324xf32, #tpu.memory_space<vmem>>, vector<1x8x16xf32>,
    %79 = vector.extract_strided_slice %37 {offsets = [0, 144], sizes = [8, 16], strides = [1, 1]} : vector<8x256xf32> to vector<8x16xf32>
    %c0_32 = arith.constant 0 : index
    %c0_33 = arith.constant 0 : index
    %c181 = arith.constant 181 : index
    %80 = vector.load %arg4[%c0_32, %c0_33, %c181] : memref<2x8x324xf32, #tpu.memory_space<vmem>>, vector<1x8x16xf32>
    %81 = vector.shape_cast %80 : vector<1x8x16xf32> to vector<8x16xf32>
    %82 = vector.shape_cast %79 : vector<8x16xf32> to vector<1x8x16xf32>
    tpu.vector_store %arg4[%c0_32, %c0_33, %c181], %82 {strides = array<i32>} : memref<2x8x324xf32, #tpu.memory_space<vmem>>, vector<1x8x16xf32>,
    %83 = vector.extract_strided_slice %37 {offsets = [0, 160], sizes = [8, 16], strides = [1, 1]} : vector<8x256xf32> to vector<8x16xf32>
    %c0_34 = arith.constant 0 : index
    %c0_35 = arith.constant 0 : index
    %c199 = arith.constant 199 : index
    %84 = vector.load %arg4[%c0_34, %c0_35, %c199] : memref<2x8x324xf32, #tpu.memory_space<vmem>>, vector<1x8x16xf32>
    %85 = vector.shape_cast %84 : vector<1x8x16xf32> to vector<8x16xf32>
    %86 = vector.shape_cast %83 : vector<8x16xf32> to vector<1x8x16xf32>
    tpu.vector_store %arg4[%c0_34, %c0_35, %c199], %86 {strides = array<i32>} : memref<2x8x324xf32, #tpu.memory_space<vmem>>, vector<1x8x16xf32>,
    %87 = vector.extract_strided_slice %37 {offsets = [0, 176], sizes = [8, 16], strides = [1, 1]} : vector<8x256xf32> to vector<8x16xf32>
    %c0_36 = arith.constant 0 : index
    %c0_37 = arith.constant 0 : index
    %c217 = arith.constant 217 : index
    %88 = vector.load %arg4[%c0_36, %c0_37, %c217] : memref<2x8x324xf32, #tpu.memory_space<vmem>>, vector<1x8x16xf32>
    %89 = vector.shape_cast %88 : vector<1x8x16xf32> to vector<8x16xf32>
    %90 = vector.shape_cast %87 : vector<8x16xf32> to vector<1x8x16xf32>
    tpu.vector_store %arg4[%c0_36, %c0_37, %c217], %90 {strides = array<i32>} : memref<2x8x324xf32, #tpu.memory_space<vmem>>, vector<1x8x16xf32>,
    %91 = vector.extract_strided_slice %37 {offsets = [0, 192], sizes = [8, 16], strides = [1, 1]} : vector<8x256xf32> to vector<8x16xf32>
    %c0_38 = arith.constant 0 : index
    %c0_39 = arith.constant 0 : index
    %c235 = arith.constant 235 : index
    %92 = vector.load %arg4[%c0_38, %c0_39, %c235] : memref<2x8x324xf32, #tpu.memory_space<vmem>>, vector<1x8x16xf32>
    %93 = vector.shape_cast %92 : vector<1x8x16xf32> to vector<8x16xf32>
    %94 = vector.shape_cast %91 : vector<8x16xf32> to vector<1x8x16xf32>
    tpu.vector_store %arg4[%c0_38, %c0_39, %c235], %94 {strides = array<i32>} : memref<2x8x324xf32, #tpu.memory_space<vmem>>, vector<1x8x16xf32>,
    %95 = vector.extract_strided_slice %37 {offsets = [0, 208], sizes = [8, 16], strides = [1, 1]} : vector<8x256xf32> to vector<8x16xf32>
    %c0_40 = arith.constant 0 : index
    %c0_41 = arith.constant 0 : index
    %c253 = arith.constant 253 : index
    %96 = vector.load %arg4[%c0_40, %c0_41, %c253] : memref<2x8x324xf32, #tpu.memory_space<vmem>>, vector<1x8x16xf32>
    %97 = vector.shape_cast %96 : vector<1x8x16xf32> to vector<8x16xf32>
    %98 = vector.shape_cast %95 : vector<8x16xf32> to vector<1x8x16xf32>
    tpu.vector_store %arg4[%c0_40, %c0_41, %c253], %98 {strides = array<i32>} : memref<2x8x324xf32, #tpu.memory_space<vmem>>, vector<1x8x16xf32>,
    %99 = vector.extract_strided_slice %37 {offsets = [0, 224], sizes = [8, 16], strides = [1, 1]} : vector<8x256xf32> to vector<8x16xf32>
    %c0_42 = arith.constant 0 : index
    %c0_43 = arith.constant 0 : index
    %c271 = arith.constant 271 : index
    %100 = vector.load %arg4[%c0_42, %c0_43, %c271] : memref<2x8x324xf32, #tpu.memory_space<vmem>>, vector<1x8x16xf32>
    %101 = vector.shape_cast %100 : vector<1x8x16xf32> to vector<8x16xf32>
    %102 = vector.shape_cast %99 : vector<8x16xf32> to vector<1x8x16xf32>
    tpu.vector_store %arg4[%c0_42, %c0_43, %c271], %102 {strides = array<i32>} : memref<2x8x324xf32, #tpu.memory_space<vmem>>, vector<1x8x16xf32>,
    %103 = vector.extract_strided_slice %37 {offsets = [0, 240], sizes = [8, 16], strides = [1, 1]} : vector<8x256xf32> to vector<8x16xf32>
    %c0_44 = arith.constant 0 : index
    %c0_45 = arith.constant 0 : index
    %c289 = arith.constant 289 : index
    %104 = vector.load %arg4[%c0_44, %c0_45, %c289] : memref<2x8x324xf32, #tpu.memory_space<vmem>>, vector<1x8x16xf32>
    %105 = vector.shape_cast %104 : vector<1x8x16xf32> to vector<8x16xf32>
    %106 = vector.shape_cast %103 : vector<8x16xf32> to vector<1x8x16xf32>
    tpu.vector_store %arg4[%c0_44, %c0_45, %c289], %106 {strides = array<i32>} : memref<2x8x324xf32, #tpu.memory_space<vmem>>, vector<1x8x16xf32>,
    %c1 = arith.constant 1 : index
    %c0_46 = arith.constant 0 : index
    %c0_47 = arith.constant 0 : index
    %107 = vector.load %arg3[%c1, %c0_46, %c0_47] : memref<2x3x256xf32, #tpu.memory_space<vmem>>, vector<1x3x256xf32>
    %108 = vector.shape_cast %107 : vector<1x3x256xf32> to vector<3x256xf32>
    %109 = vector.extract_strided_slice %0 {offsets = [0, 0], sizes = [8, 1], strides = [1, 1]} : vector<8x3xf32> to vector<8x1xf32>
    %110 = vector.extract_strided_slice %108 {offsets = [0, 0], sizes = [1, 256], strides = [1, 1]} : vector<3x256xf32> to vector<1x256xf32>
    %111 = vector.shape_cast %110 : vector<1x256xf32> to vector<1x256xf32>
    %112 = vector.broadcast %111 : vector<1x256xf32> to vector<8x256xf32>
    %113 = vector.broadcast %109 : vector<8x1xf32> to vector<8x256xf32>
    %114 = arith.mulf %113, %112 : vector<8x256xf32>
    %115 = vector.broadcast %1 : vector<8x1xf32> to vector<8x256xf32>
    %116 = arith.addf %115, %114 : vector<8x256xf32>
    %117 = vector.extract_strided_slice %0 {offsets = [0, 1], sizes = [8, 1], strides = [1, 1]} : vector<8x3xf32> to vector<8x1xf32>
    %118 = vector.extract_strided_slice %108 {offsets = [1, 0], sizes = [1, 256], strides = [1, 1]} : vector<3x256xf32> to vector<1x256xf32>
    %119 = vector.shape_cast %118 : vector<1x256xf32> to vector<1x256xf32>
    %120 = vector.broadcast %119 : vector<1x256xf32> to vector<8x256xf32>
    %121 = vector.broadcast %117 : vector<8x1xf32> to vector<8x256xf32>
    %122 = arith.mulf %121, %120 : vector<8x256xf32>
    %123 = arith.addf %116, %122 : vector<8x256xf32>
    %124 = vector.extract_strided_slice %0 {offsets = [0, 2], sizes = [8, 1], strides = [1, 1]} : vector<8x3xf32> to vector<8x1xf32>
    %125 = vector.extract_strided_slice %108 {offsets = [2, 0], sizes = [1, 256], strides = [1, 1]} : vector<3x256xf32> to vector<1x256xf32>
    %126 = vector.shape_cast %125 : vector<1x256xf32> to vector<1x256xf32>
    %127 = vector.broadcast %126 : vector<1x256xf32> to vector<8x256xf32>
    %128 = vector.broadcast %124 : vector<8x1xf32> to vector<8x256xf32>
    %129 = arith.mulf %128, %127 : vector<8x256xf32>
    %130 = arith.addf %123, %129 : vector<8x256xf32>
    %cst_48 = arith.constant 0.000000e+00 : f32
    %cst_49 = arith.constant 6.000000e+00 : f32
    %131 = vector.broadcast %cst_48 : f32 to vector<8x256xf32>
    %132 = arith.maximumf %131, %130 : vector<8x256xf32>
    %133 = vector.broadcast %cst_49 : f32 to vector<8x256xf32>
    %134 = arith.minimumf %133, %132 : vector<8x256xf32>
    %cst_50 = arith.constant 0.166666672 : f32
    %135 = vector.broadcast %cst_50 : f32 to vector<8x256xf32>
    %136 = arith.mulf %134, %135 : vector<8x256xf32>
    %137 = vector.shape_cast %7 : vector<8x1xf32> to vector<8x1xf32>
    %138 = vector.broadcast %137 : vector<8x1xf32> to vector<8x324xf32>
    %c1_51 = arith.constant 1 : index
    %c0_52 = arith.constant 0 : index
    %c0_53 = arith.constant 0 : index
    %139 = vector.load %arg4[%c1_51, %c0_52, %c0_53] : memref<2x8x324xf32, #tpu.memory_space<vmem>>, vector<1x8x324xf32>
    %140 = vector.shape_cast %139 : vector<1x8x324xf32> to vector<8x324xf32>
    %141 = vector.shape_cast %138 : vector<8x324xf32> to vector<1x8x324xf32>
    tpu.vector_store %arg4[%c1_51, %c0_52, %c0_53], %141 {strides = array<i32>} : memref<2x8x324xf32, #tpu.memory_space<vmem>>, vector<1x8x324xf32>,
    %142 = vector.extract_strided_slice %136 {offsets = [0, 0], sizes = [8, 16], strides = [1, 1]} : vector<8x256xf32> to vector<8x16xf32>
    %c1_54 = arith.constant 1 : index
    %c0_55 = arith.constant 0 : index
    %c19_56 = arith.constant 19 : index
    %143 = vector.load %arg4[%c1_54, %c0_55, %c19_56] : memref<2x8x324xf32, #tpu.memory_space<vmem>>, vector<1x8x16xf32>
    %144 = vector.shape_cast %143 : vector<1x8x16xf32> to vector<8x16xf32>
    %145 = vector.shape_cast %142 : vector<8x16xf32> to vector<1x8x16xf32>
    tpu.vector_store %arg4[%c1_54, %c0_55, %c19_56], %145 {strides = array<i32>} : memref<2x8x324xf32, #tpu.memory_space<vmem>>, vector<1x8x16xf32>,
    %146 = vector.extract_strided_slice %136 {offsets = [0, 16], sizes = [8, 16], strides = [1, 1]} : vector<8x256xf32> to vector<8x16xf32>
    %c1_57 = arith.constant 1 : index
    %c0_58 = arith.constant 0 : index
    %c37_59 = arith.constant 37 : index
    %147 = vector.load %arg4[%c1_57, %c0_58, %c37_59] : memref<2x8x324xf32, #tpu.memory_space<vmem>>, vector<1x8x16xf32>
    %148 = vector.shape_cast %147 : vector<1x8x16xf32> to vector<8x16xf32>
    %149 = vector.shape_cast %146 : vector<8x16xf32> to vector<1x8x16xf32>
    tpu.vector_store %arg4[%c1_57, %c0_58, %c37_59], %149 {strides = array<i32>} : memref<2x8x324xf32, #tpu.memory_space<vmem>>, vector<1x8x16xf32>,
    %150 = vector.extract_strided_slice %136 {offsets = [0, 32], sizes = [8, 16], strides = [1, 1]} : vector<8x256xf32> to vector<8x16xf32>
    %c1_60 = arith.constant 1 : index
    %c0_61 = arith.constant 0 : index
    %c55_62 = arith.constant 55 : index
    %151 = vector.load %arg4[%c1_60, %c0_61, %c55_62] : memref<2x8x324xf32, #tpu.memory_space<vmem>>, vector<1x8x16xf32>
    %152 = vector.shape_cast %151 : vector<1x8x16xf32> to vector<8x16xf32>
    %153 = vector.shape_cast %150 : vector<8x16xf32> to vector<1x8x16xf32>
    tpu.vector_store %arg4[%c1_60, %c0_61, %c55_62], %153 {strides = array<i32>} : memref<2x8x324xf32, #tpu.memory_space<vmem>>, vector<1x8x16xf32>,
    %154 = vector.extract_strided_slice %136 {offsets = [0, 48], sizes = [8, 16], strides = [1, 1]} : vector<8x256xf32> to vector<8x16xf32>
    %c1_63 = arith.constant 1 : index
    %c0_64 = arith.constant 0 : index
    %c73_65 = arith.constant 73 : index
    %155 = vector.load %arg4[%c1_63, %c0_64, %c73_65] : memref<2x8x324xf32, #tpu.memory_space<vmem>>, vector<1x8x16xf32>
    %156 = vector.shape_cast %155 : vector<1x8x16xf32> to vector<8x16xf32>
    %157 = vector.shape_cast %154 : vector<8x16xf32> to vector<1x8x16xf32>
    tpu.vector_store %arg4[%c1_63, %c0_64, %c73_65], %157 {strides = array<i32>} : memref<2x8x324xf32, #tpu.memory_space<vmem>>, vector<1x8x16xf32>,
    %158 = vector.extract_strided_slice %136 {offsets = [0, 64], sizes = [8, 16], strides = [1, 1]} : vector<8x256xf32> to vector<8x16xf32>
    %c1_66 = arith.constant 1 : index
    %c0_67 = arith.constant 0 : index
    %c91_68 = arith.constant 91 : index
    %159 = vector.load %arg4[%c1_66, %c0_67, %c91_68] : memref<2x8x324xf32, #tpu.memory_space<vmem>>, vector<1x8x16xf32>
    %160 = vector.shape_cast %159 : vector<1x8x16xf32> to vector<8x16xf32>
    %161 = vector.shape_cast %158 : vector<8x16xf32> to vector<1x8x16xf32>
    tpu.vector_store %arg4[%c1_66, %c0_67, %c91_68], %161 {strides = array<i32>} : memref<2x8x324xf32, #tpu.memory_space<vmem>>, vector<1x8x16xf32>,
    %162 = vector.extract_strided_slice %136 {offsets = [0, 80], sizes = [8, 16], strides = [1, 1]} : vector<8x256xf32> to vector<8x16xf32>
    %c1_69 = arith.constant 1 : index
    %c0_70 = arith.constant 0 : index
    %c109_71 = arith.constant 109 : index
    %163 = vector.load %arg4[%c1_69, %c0_70, %c109_71] : memref<2x8x324xf32, #tpu.memory_space<vmem>>, vector<1x8x16xf32>
    %164 = vector.shape_cast %163 : vector<1x8x16xf32> to vector<8x16xf32>
    %165 = vector.shape_cast %162 : vector<8x16xf32> to vector<1x8x16xf32>
    tpu.vector_store %arg4[%c1_69, %c0_70, %c109_71], %165 {strides = array<i32>} : memref<2x8x324xf32, #tpu.memory_space<vmem>>, vector<1x8x16xf32>,
    %166 = vector.extract_strided_slice %136 {offsets = [0, 96], sizes = [8, 16], strides = [1, 1]} : vector<8x256xf32> to vector<8x16xf32>
    %c1_72 = arith.constant 1 : index
    %c0_73 = arith.constant 0 : index
    %c127_74 = arith.constant 127 : index
    %167 = vector.load %arg4[%c1_72, %c0_73, %c127_74] : memref<2x8x324xf32, #tpu.memory_space<vmem>>, vector<1x8x16xf32>
    %168 = vector.shape_cast %167 : vector<1x8x16xf32> to vector<8x16xf32>
    %169 = vector.shape_cast %166 : vector<8x16xf32> to vector<1x8x16xf32>
    tpu.vector_store %arg4[%c1_72, %c0_73, %c127_74], %169 {strides = array<i32>} : memref<2x8x324xf32, #tpu.memory_space<vmem>>, vector<1x8x16xf32>,
    %170 = vector.extract_strided_slice %136 {offsets = [0, 112], sizes = [8, 16], strides = [1, 1]} : vector<8x256xf32> to vector<8x16xf32>
    %c1_75 = arith.constant 1 : index
    %c0_76 = arith.constant 0 : index
    %c145_77 = arith.constant 145 : index
    %171 = vector.load %arg4[%c1_75, %c0_76, %c145_77] : memref<2x8x324xf32, #tpu.memory_space<vmem>>, vector<1x8x16xf32>
    %172 = vector.shape_cast %171 : vector<1x8x16xf32> to vector<8x16xf32>
    %173 = vector.shape_cast %170 : vector<8x16xf32> to vector<1x8x16xf32>
    tpu.vector_store %arg4[%c1_75, %c0_76, %c145_77], %173 {strides = array<i32>} : memref<2x8x324xf32, #tpu.memory_space<vmem>>, vector<1x8x16xf32>,
    %174 = vector.extract_strided_slice %136 {offsets = [0, 128], sizes = [8, 16], strides = [1, 1]} : vector<8x256xf32> to vector<8x16xf32>
    %c1_78 = arith.constant 1 : index
    %c0_79 = arith.constant 0 : index
    %c163_80 = arith.constant 163 : index
    %175 = vector.load %arg4[%c1_78, %c0_79, %c163_80] : memref<2x8x324xf32, #tpu.memory_space<vmem>>, vector<1x8x16xf32>
    %176 = vector.shape_cast %175 : vector<1x8x16xf32> to vector<8x16xf32>
    %177 = vector.shape_cast %174 : vector<8x16xf32> to vector<1x8x16xf32>
    tpu.vector_store %arg4[%c1_78, %c0_79, %c163_80], %177 {strides = array<i32>} : memref<2x8x324xf32, #tpu.memory_space<vmem>>, vector<1x8x16xf32>,
    %178 = vector.extract_strided_slice %136 {offsets = [0, 144], sizes = [8, 16], strides = [1, 1]} : vector<8x256xf32> to vector<8x16xf32>
    %c1_81 = arith.constant 1 : index
    %c0_82 = arith.constant 0 : index
    %c181_83 = arith.constant 181 : index
    %179 = vector.load %arg4[%c1_81, %c0_82, %c181_83] : memref<2x8x324xf32, #tpu.memory_space<vmem>>, vector<1x8x16xf32>
    %180 = vector.shape_cast %179 : vector<1x8x16xf32> to vector<8x16xf32>
    %181 = vector.shape_cast %178 : vector<8x16xf32> to vector<1x8x16xf32>
    tpu.vector_store %arg4[%c1_81, %c0_82, %c181_83], %181 {strides = array<i32>} : memref<2x8x324xf32, #tpu.memory_space<vmem>>, vector<1x8x16xf32>,
    %182 = vector.extract_strided_slice %136 {offsets = [0, 160], sizes = [8, 16], strides = [1, 1]} : vector<8x256xf32> to vector<8x16xf32>
    %c1_84 = arith.constant 1 : index
    %c0_85 = arith.constant 0 : index
    %c199_86 = arith.constant 199 : index
    %183 = vector.load %arg4[%c1_84, %c0_85, %c199_86] : memref<2x8x324xf32, #tpu.memory_space<vmem>>, vector<1x8x16xf32>
    %184 = vector.shape_cast %183 : vector<1x8x16xf32> to vector<8x16xf32>
    %185 = vector.shape_cast %182 : vector<8x16xf32> to vector<1x8x16xf32>
    tpu.vector_store %arg4[%c1_84, %c0_85, %c199_86], %185 {strides = array<i32>} : memref<2x8x324xf32, #tpu.memory_space<vmem>>, vector<1x8x16xf32>,
    %186 = vector.extract_strided_slice %136 {offsets = [0, 176], sizes = [8, 16], strides = [1, 1]} : vector<8x256xf32> to vector<8x16xf32>
    %c1_87 = arith.constant 1 : index
    %c0_88 = arith.constant 0 : index
    %c217_89 = arith.constant 217 : index
    %187 = vector.load %arg4[%c1_87, %c0_88, %c217_89] : memref<2x8x324xf32, #tpu.memory_space<vmem>>, vector<1x8x16xf32>
    %188 = vector.shape_cast %187 : vector<1x8x16xf32> to vector<8x16xf32>
    %189 = vector.shape_cast %186 : vector<8x16xf32> to vector<1x8x16xf32>
    tpu.vector_store %arg4[%c1_87, %c0_88, %c217_89], %189 {strides = array<i32>} : memref<2x8x324xf32, #tpu.memory_space<vmem>>, vector<1x8x16xf32>,
    %190 = vector.extract_strided_slice %136 {offsets = [0, 192], sizes = [8, 16], strides = [1, 1]} : vector<8x256xf32> to vector<8x16xf32>
    %c1_90 = arith.constant 1 : index
    %c0_91 = arith.constant 0 : index
    %c235_92 = arith.constant 235 : index
    %191 = vector.load %arg4[%c1_90, %c0_91, %c235_92] : memref<2x8x324xf32, #tpu.memory_space<vmem>>, vector<1x8x16xf32>
    %192 = vector.shape_cast %191 : vector<1x8x16xf32> to vector<8x16xf32>
    %193 = vector.shape_cast %190 : vector<8x16xf32> to vector<1x8x16xf32>
    tpu.vector_store %arg4[%c1_90, %c0_91, %c235_92], %193 {strides = array<i32>} : memref<2x8x324xf32, #tpu.memory_space<vmem>>, vector<1x8x16xf32>,
    %194 = vector.extract_strided_slice %136 {offsets = [0, 208], sizes = [8, 16], strides = [1, 1]} : vector<8x256xf32> to vector<8x16xf32>
    %c1_93 = arith.constant 1 : index
    %c0_94 = arith.constant 0 : index
    %c253_95 = arith.constant 253 : index
    %195 = vector.load %arg4[%c1_93, %c0_94, %c253_95] : memref<2x8x324xf32, #tpu.memory_space<vmem>>, vector<1x8x16xf32>
    %196 = vector.shape_cast %195 : vector<1x8x16xf32> to vector<8x16xf32>
    %197 = vector.shape_cast %194 : vector<8x16xf32> to vector<1x8x16xf32>
    tpu.vector_store %arg4[%c1_93, %c0_94, %c253_95], %197 {strides = array<i32>} : memref<2x8x324xf32, #tpu.memory_space<vmem>>, vector<1x8x16xf32>,
    %198 = vector.extract_strided_slice %136 {offsets = [0, 224], sizes = [8, 16], strides = [1, 1]} : vector<8x256xf32> to vector<8x16xf32>
    %c1_96 = arith.constant 1 : index
    %c0_97 = arith.constant 0 : index
    %c271_98 = arith.constant 271 : index
    %199 = vector.load %arg4[%c1_96, %c0_97, %c271_98] : memref<2x8x324xf32, #tpu.memory_space<vmem>>, vector<1x8x16xf32>
    %200 = vector.shape_cast %199 : vector<1x8x16xf32> to vector<8x16xf32>
    %201 = vector.shape_cast %198 : vector<8x16xf32> to vector<1x8x16xf32>
    tpu.vector_store %arg4[%c1_96, %c0_97, %c271_98], %201 {strides = array<i32>} : memref<2x8x324xf32, #tpu.memory_space<vmem>>, vector<1x8x16xf32>,
    %202 = vector.extract_strided_slice %136 {offsets = [0, 240], sizes = [8, 16], strides = [1, 1]} : vector<8x256xf32> to vector<8x16xf32>
    %c1_99 = arith.constant 1 : index
    %c0_100 = arith.constant 0 : index
    %c289_101 = arith.constant 289 : index
    %203 = vector.load %arg4[%c1_99, %c0_100, %c289_101] : memref<2x8x324xf32, #tpu.memory_space<vmem>>, vector<1x8x16xf32>
    %204 = vector.shape_cast %203 : vector<1x8x16xf32> to vector<8x16xf32>
    %205 = vector.shape_cast %202 : vector<8x16xf32> to vector<1x8x16xf32>
    tpu.vector_store %arg4[%c1_99, %c0_100, %c289_101], %205 {strides = array<i32>} : memref<2x8x324xf32, #tpu.memory_space<vmem>>, vector<1x8x16xf32>,
    return
  }
  func.func @transform_0(%arg0: i32) -> (i32, i32) {
    %c0_i32 = arith.constant 0 : i32
    %c0_i32_0 = arith.constant 0 : i32
    %c0_i32_1 = arith.constant 0 : i32
    return %c0_i32, %c0_i32_0 : i32, i32
  }
  func.func @transform_1(%arg0: i32) -> (i32, i32) {
    %c0_i32 = arith.constant 0 : i32
    %c0_i32_0 = arith.constant 0 : i32
    %c0_i32_1 = arith.constant 0 : i32
    return %c0_i32, %c0_i32_0 : i32, i32
  }
  func.func @transform_2(%arg0: i32) -> (i32, i32, i32) {
    %c0_i32 = arith.constant 0 : i32
    %c0_i32_0 = arith.constant 0 : i32
    %c0_i32_1 = arith.constant 0 : i32
    return %arg0, %c0_i32, %c0_i32_0 : i32, i32, i32
  }
  func.func @transform_3(%arg0: i32) -> (i32, i32, i32) {
    %c0_i32 = arith.constant 0 : i32
    %c0_i32_0 = arith.constant 0 : i32
    %c0_i32_1 = arith.constant 0 : i32
    return %arg0, %c0_i32, %c0_i32_0 : i32, i32, i32
  }
}

</mosaic_0001>

<bundles_post_ra>
// kernel: tpu_custom_call.1
= control target key start
LH: loop header
LB: loop body
LE: loop exit
PB: predicated region body
PF: predicated region fallthrough
CT: control target
= control target key end

     0   :  { %v420_v2 = vmov 0   ;;  %v421_v3 = vmov 1   ;;  %s508_s0 = inlined_call_operand.vmem [shape: f32[8,3], index: 0, kind: input, shape index: {}]   ;;  %s509_s1 = inlined_call_operand.vmem [shape: f32[8,1], index: 1, kind: input, shape index: {}]   ;;  %s510_s2 = inlined_call_operand.vmem [shape: f32[2,3,256], index: 2, kind: input, shape index: {}]   ;;  %s511_s3 = inlined_call_operand.hbm [shape: f32[2,8,324], index: 3, kind: output, shape index: {}]  }
   0x1   :  { %v15_v0 = vld [vmem:[%s508_s0] sm:$0xff]  ;;  %393 = vset.pattern.permute.xlu0 %v420_v2  ;;  %394 = vset.pattern.permute.xlu1 %v421_v3 }
   0x2   :  { %v16_v1 = vld [vmem:[%s509_s1] sm:$0xff]  ;;  %42 = vperm.xlu0 %393, %v15_v0   ;;  %73 = vperm.xlu1 %394, %v15_v0  }
   0x3   :  { %v17_v4 = vmax.f32 %v16_v1, 0.0 }
   0x4   :  { %8 = vsyncpa [#allocation3], 0  ;;  %v422_v7 = vmov 2   ;;  %v22_v8 = vlaneseq  ;;  %v20_v11 = vld [vmem:[%s510_s2] sm:$0x77]  ;;  %vm119_vm0 = vcmask 556032  }
   0x5   :  { %v18_v5 = vmin.f32 %v17_v4, 6.0  ;;  %v370_v13 = vld [vmem:[%s510_s2 + $0x8] sm:$0x77]  ;;  %s423_s2 = smov 31   ;;  %s424_s18 = smov 33   ;;  %vm157_vm1 = vcmask 121856  }
   0x6   :  { %49 = vperm.xlu0 %393, %v16_v1   ;;  %395 = vset.pattern.permute.xlu1 %v422_v7  ;;  %v23_v9 = vshrl.u32 %v22_v8, 7  ;;  %s425_s19 = smov 19   ;;  %s426_s20 = smov 35   ;;  %vm125_vm2 = vcmask 285848   ;;  %vm162_vm3 = vcmask 269448   ;;  %vm130_vm4 = vcmask 433448  }
   0x7   :  { %v19_v6 = vmul.f32 0.16666667, %v18_v5  ;;  %99 = vperm.xlu1 %395, %v15_v0   ;;  %s427_s21 = smov 21   ;;  %s428_s22 = smov 37   ;;  %vm168_vm5 = vcmask 417048   ;;  %vm135_vm6 = vcmask 581048  }
   0x8   :  { %v24_v10 = vsub.s32 0, %v23_v9  ;;  %v28_v12 = vsub.s32 4, %v23_v9  ;;  %v56_v14 = vsub.s32 1, %v23_v9  ;;  %v474_v15 = vsub.s32 2, %v23_v9  ;;  %s429_s23 = smov 23   ;;  %s430_s24 = smov 39  }
   0x9   :  { %v60_v19 = vsub.s32 5, %v23_v9  ;;  %v86_v26 = vsub.s32 6, %v23_v9  ;;  %s431_s25 = smov 25   ;;  %s432_s26 = smov 41   ;;  %vm173_vm7 = vcmask 564648   ;;  %vm140_vm8 = vcmask 728648  }
   0xa   :  { %114 = vperm.xlu0 %393, %v19_v6   ;;  %v25_v16 = vrot.slane %v20_v11, %v24_v10  ;;  %v213_v17 = vrot.slane %v370_v13, %v24_v10  ;;  %v29_v18 = vrot.slane %v20_v11, %v28_v12  ;;  %v57_v20 = vrot.slane %v20_v11, %v56_v14  ;;  %s433_s27 = smov 27   ;;  %s434_s28 = smov 45  }
   0xb   :  { %v235_v21 = vrot.slane %v370_v13, %v56_v14  ;;  %v83_v22 = vrot.slane %v20_v11, %v474_v15  ;;  %v257_v23 = vrot.slane %v370_v13, %v474_v15  ;;  %v217_v28 = vrot.slane %v370_v13, %v28_v12  ;;  %s435_s29 = smov 43   ;;  %s436_s30 = smov 29  }
   0xc   :  { %v35_v24 = vrot.slane %v25_v16, %v24_v10  ;;  %v223_v25 = vrot.slane %v213_v17, %v24_v10  ;;  %v39_v27 = vrot.slane %v29_v18, %v24_v10  ;;  %v61_v30 = vrot.slane %v20_v11, %v60_v19  ;;  %s437_s4 = smov 47   ;;  %s438_s5 = smov 49  }
   0xd   :  { %v67_v32 = vrot.slane %v57_v20, %v56_v14  ;;  %v245_v33 = vrot.slane %v235_v21, %v56_v14  ;;  %v93_v34 = vrot.slane %v83_v22, %v474_v15  ;;  %v267_v35 = vrot.slane %v257_v23, %v474_v15  ;;  %s439_s6 = smov [#allocation2]  }
   0xe   :  { %v87_v38 = vrot.slane %v20_v11, %v86_v26  ;;  %v227_v39 = vrot.slane %v217_v28, %v24_v10  ;;  %v71_v41 = vrot.slane %v61_v30, %v56_v14  ;;  %v239_v42 = vrot.slane %v370_v13, %v60_v19  ;;  %s359_s7 = sshll.u32 %s439_s6, 4  ;;  %s360_s7 = int_to_ptr.vmem [resolvable:$true] %s359_s7 }
   0xf   :  { %v261_v49 = vrot.slane %v370_v13, %v86_v26  ;;  %vm178_vm9 = vcmask 712248   ;;  %vm145_vm10 = vcmask 876248   ;;  %vm183_vm11 = vcmask 859848   ;;  %s396_s8 = scalar_lea.vmem %s360_s7, 768  ;;  %p401_p1 = scmp.lt.s32.totalorder %s360_s7, %s360_s7 }
  0x10   :  { %v97_v55 = vrot.slane %v87_v38, %v474_v15  ;;  %v249_v58 = vrot.slane %v239_v42, %v56_v14  ;;  %vm195_vm12 = vcmask 105472   ;;  %vm150_vm13 = vcmask 1023848   ;;  %p397_p0 = scmp.ne.s32.totalorder %s360_s7, %s396_s8  ;;  %p402_p2 = scmp.lt.s32.totalorder %s396_s8, %s396_s8 }
  0x11   :  { %v271_v63 = vrot.slane %v261_v49, %v474_v15  ;;  %vm188_vm14 = vcmask 1007448   ;;  %vm155_vm15 = vcmask 1048568  }
  0x12   :  { %p403_p3 = por %p402_p2, %p401_p1 }
  0x14   :  { %p404_p4 = pnand %p403_p3, %p397_p0 }
  0x81   :  { %v43_v29 = vpop.permute.xlu0 %42  ;;  %v74_v31 = vpop.permute.xlu1 %73 }
  0x82   :  { %v45_v36 = vmul.f32 %v43_v29, %v35_v24  ;;  %v228_v37 = vmul.f32 %v223_v25, %v43_v29  ;;  %v46_v40 = vmul.f32 %v43_v29, %v39_v27  ;;  %v76_v44 = vmul.f32 %v74_v31, %v67_v32 }
  0x83   :  { %v250_v45 = vmul.f32 %v245_v33, %v74_v31  ;;  %v229_v56 = vmul.f32 %v227_v39, %v43_v29  ;;  %v77_v59 = vmul.f32 %v74_v31, %v71_v41  ;;  %v251_v4 = vmul.f32 %v249_v58, %v74_v31 }
  0x85   :  { %v50_v43 = vpop.permute.xlu0 %49 }
  0x86   :  { %v52_v46 = vadd.f32 %v50_v43, %v45_v36  ;;  %v230_v47 = vadd.f32 %v228_v37, %v50_v43  ;;  %v100_v48 = vpop.permute.xlu1 %99  ;;  %v53_v52 = vadd.f32 %v50_v43, %v46_v40  ;;  %v231_v62 = vadd.f32 %v229_v56, %v50_v43 }
  0x87   :  { %v102_v50 = vmul.f32 %v100_v48, %v93_v34  ;;  %v272_v51 = vmul.f32 %v267_v35, %v100_v48  ;;  %v103_v1 = vmul.f32 %v100_v48, %v97_v55  ;;  %v273_v7 = vmul.f32 %v271_v63, %v100_v48 }
  0x88   :  { %v78_v53 = vadd.f32 %v76_v44, %v52_v46  ;;  %v252_v54 = vadd.f32 %v250_v45, %v230_v47  ;;  %v79_v0 = vadd.f32 %v77_v59, %v53_v52  ;;  %v253_v8 = vadd.f32 %v251_v4, %v231_v62 }
  0x89   :  { %v115_v57 = vpop.permute.xlu0 %114 }
  0x8a   :  { %v104_v60 = vadd.f32 %v102_v50, %v78_v53  ;;  %v274_v61 = vadd.f32 %v272_v51, %v252_v54  ;;  %117 = vst [vmem:[#allocation2] sm:$0xff] %v115_v57  ;;  %118 = vst [vmem:[#allocation2 + $0x8] sm:$0xff] %v115_v57  ;;  %v105_v9 = vadd.f32 %v103_v1, %v79_v0 }
  0x8b   :  { %283 = vst [vmem:[#allocation2 + $0x18] sm:$0xff] %v115_v57  ;;  %284 = vst [vmem:[#allocation2 + $0x20] sm:$0xff] %v115_v57  ;;  %v275_v13 = vadd.f32 %v273_v7, %v253_v8 }
  0x8c   :  { %120 = vst.msk [vmem:[#allocation2 + $0x10] sm:$0xff] %vm119_vm0, %v115_v57  ;;  %285 = vst.msk [vmem:[#allocation2 + $0x28] sm:$0xff] %vm119_vm0, %v115_v57  ;;  %v106_v2 = vmax.f32 %v104_v60, 0.0  ;;  %v276_v3 = vmax.f32 %v274_v61, 0.0  ;;  %v107_v12 = vmax.f32 %v105_v9, 0.0  ;;  %vm193_vm0 = vcmask 1048552  }
  0x8d   :  { %v277_v15 = vmax.f32 %v275_v13, 0.0 }
  0x8e   :  { %v108_v5 = vmin.f32 %v106_v2, 6.0  ;;  %v278_v6 = vmin.f32 %v276_v3, 6.0  ;;  %v109_v14 = vmin.f32 %v107_v12, 6.0 }
  0x8f   :  { %v279_v17 = vmin.f32 %v277_v15, 6.0 }
  0x90   :  { %v110_v10 = vmul.f32 0.16666667, %v108_v5  ;;  %v280_v11 = vmul.f32 0.16666667, %v278_v6  ;;  %v111_v16 = vmul.f32 0.16666667, %v109_v14 }
  0x91   :  { %v281_v18 = vmul.f32 0.16666667, %v279_v17 }
  0x92   :  { %311 = vrot.lane.b32.xlu0 %v280_v11, %s423_s2  ;;  %152 = vrot.lane.b32.xlu1 %v110_v10, %s423_s2 }
  0x96   :  { %159 = vrot.lane.b32.xlu0 %v110_v10, %s424_s18  ;;  %122 = vrot.lane.b32.xlu1 %v110_v10, %s425_s19 }
  0x9a   :  { %316 = vrot.lane.b32.xlu0 %v280_v11, %s424_s18  ;;  %287 = vrot.lane.b32.xlu1 %v280_v11, %s425_s19 }
  0x9e   :  { %165 = vrot.lane.b32.xlu0 %v111_v16, %s426_s20  ;;  %127 = vrot.lane.b32.xlu1 %v110_v10, %s427_s21 }
  0xa2   :  { %321 = vrot.lane.b32.xlu0 %v281_v18, %s426_s20  ;;  %291 = vrot.lane.b32.xlu1 %v280_v11, %s427_s21 }
  0xa6   :  { %170 = vrot.lane.b32.xlu0 %v111_v16, %s428_s22  ;;  %132 = vrot.lane.b32.xlu1 %v110_v10, %s429_s23 }
  0xaa   :  { %325 = vrot.lane.b32.xlu0 %v281_v18, %s428_s22  ;;  %295 = vrot.lane.b32.xlu1 %v280_v11, %s429_s23 }
  0xae   :  { %175 = vrot.lane.b32.xlu0 %v111_v16, %s430_s24  ;;  %137 = vrot.lane.b32.xlu1 %v110_v10, %s431_s25 }
  0xb2   :  { %329 = vrot.lane.b32.xlu0 %v281_v18, %s430_s24  ;;  %299 = vrot.lane.b32.xlu1 %v280_v11, %s431_s25 }
  0xb6   :  { %180 = vrot.lane.b32.xlu0 %v111_v16, %s432_s26  ;;  %142 = vrot.lane.b32.xlu1 %v110_v10, %s433_s27 }
  0xba   :  { %303 = vrot.lane.b32.xlu0 %v280_v11, %s433_s27  ;;  %190 = vrot.lane.b32.xlu1 %v111_v16, %s434_s28 }
  0xbe   :  { %341 = vrot.lane.b32.xlu0 %v281_v18, %s434_s28  ;;  %333 = vrot.lane.b32.xlu1 %v281_v18, %s432_s26 }
  0xc2   :  { %185 = vrot.lane.b32.xlu0 %v111_v16, %s435_s29  ;;  %147 = vrot.lane.b32.xlu1 %v110_v10, %s436_s30 }
  0xc6   :  { %307 = vrot.lane.b32.xlu0 %v280_v11, %s436_s30  ;;  %197 = vrot.lane.b32.xlu1 %v111_v16, %s437_s4 }
  0xca   :  { %346 = vrot.lane.b32.xlu0 %v281_v18, %s437_s4  ;;  %337 = vrot.lane.b32.xlu1 %v281_v18, %s435_s29 }
  0xce   :  { %350 = vrot.lane.b32.xlu0 %v281_v18, %s438_s5  ;;  %202 = vrot.lane.b32.xlu1 %v111_v16, %s438_s5 }
 0x104   :  { %v484_v19 = vpop.permute.xlu1 %152  ;;  %v486_v20 = vpop.permute.xlu0 %311 }
 0x105   :  { %158 = vst.msk [vmem:[#allocation2 + $0x8] sm:$0xff] %vm157_vm1, %v484_v19  ;;  %315 = vst.msk [vmem:[#allocation2 + $0x20] sm:$0xff] %vm157_vm1, %v486_v20  ;;  %vm200_vm1 = vcmask 253048  }
 0x108   :  { %v123_v21 = vpop.permute.xlu1 %122  ;;  %v160_v22 = vpop.permute.xlu0 %159 }
 0x109   :  { %126 = vst.msk [vmem:[#allocation2] sm:$0xff] %vm125_vm2, %v123_v21 }
 0x10a   :  { %163 = vst.msk [vmem:[#allocation2 + $0x8] sm:$0xff] %vm162_vm3, %v160_v22 }
 0x10c   :  { %v288_v23 = vpop.permute.xlu1 %287  ;;  %v317_v24 = vpop.permute.xlu0 %316 }
 0x10d   :  { %290 = vst.msk [vmem:[#allocation2 + $0x18] sm:$0xff] %vm125_vm2, %v288_v23  ;;  %vm205_vm2 = vcmask 400648  }
 0x10e   :  { %319 = vst.msk [vmem:[#allocation2 + $0x20] sm:$0xff] %vm162_vm3, %v317_v24 }
 0x110   :  { %v128_v25 = vpop.permute.xlu1 %127  ;;  %v166_v26 = vpop.permute.xlu0 %165 }
 0x111   :  { %131 = vst.msk [vmem:[#allocation2] sm:$0xff] %vm130_vm4, %v128_v25 }
 0x112   :  { %169 = vst.msk [vmem:[#allocation2 + $0x8] sm:$0xff] %vm168_vm5, %v166_v26 }
 0x114   :  { %v292_v27 = vpop.permute.xlu1 %291  ;;  %v322_v28 = vpop.permute.xlu0 %321 }
 0x115   :  { %294 = vst.msk [vmem:[#allocation2 + $0x18] sm:$0xff] %vm130_vm4, %v292_v27 }
 0x116   :  { %324 = vst.msk [vmem:[#allocation2 + $0x20] sm:$0xff] %vm168_vm5, %v322_v28 }
 0x118   :  { %v133_v29 = vpop.permute.xlu1 %132  ;;  %v171_v30 = vpop.permute.xlu0 %170 }
 0x119   :  { %136 = vst.msk [vmem:[#allocation2] sm:$0xff] %vm135_vm6, %v133_v29 }
 0x11a   :  { %174 = vst.msk [vmem:[#allocation2 + $0x8] sm:$0xff] %vm173_vm7, %v171_v30 }
 0x11c   :  { %v296_v31 = vpop.permute.xlu1 %295  ;;  %v326_v32 = vpop.permute.xlu0 %325 }
 0x11d   :  { %298 = vst.msk [vmem:[#allocation2 + $0x18] sm:$0xff] %vm135_vm6, %v296_v31 }
 0x11e   :  { %328 = vst.msk [vmem:[#allocation2 + $0x20] sm:$0xff] %vm173_vm7, %v326_v32 }
 0x120   :  { %v138_v33 = vpop.permute.xlu1 %137  ;;  %v176_v34 = vpop.permute.xlu0 %175 }
 0x121   :  { %141 = vst.msk [vmem:[#allocation2] sm:$0xff] %vm140_vm8, %v138_v33 }
 0x122   :  { %179 = vst.msk [vmem:[#allocation2 + $0x8] sm:$0xff] %vm178_vm9, %v176_v34 }
 0x124   :  { %v300_v35 = vpop.permute.xlu1 %299  ;;  %v330_v36 = vpop.permute.xlu0 %329 }
 0x125   :  { %302 = vst.msk [vmem:[#allocation2 + $0x18] sm:$0xff] %vm140_vm8, %v300_v35 }
 0x126   :  { %332 = vst.msk [vmem:[#allocation2 + $0x20] sm:$0xff] %vm178_vm9, %v330_v36 }
 0x128   :  { %v143_v37 = vpop.permute.xlu1 %142  ;;  %v181_v38 = vpop.permute.xlu0 %180 }
 0x129   :  { %146 = vst.msk [vmem:[#allocation2] sm:$0xff] %vm145_vm10, %v143_v37 }
 0x12a   :  { %184 = vst.msk [vmem:[#allocation2 + $0x8] sm:$0xff] %vm183_vm11, %v181_v38 }
 0x12c   :  { %v191_v39 = vpop.permute.xlu1 %190  ;;  %v304_v40 = vpop.permute.xlu0 %303 }
 0x12d   :  { %196 = vst.msk [vmem:[#allocation2 + $0x10] sm:$0xff] %vm195_vm12, %v191_v39 }
 0x12e   :  { %306 = vst.msk [vmem:[#allocation2 + $0x18] sm:$0xff] %vm145_vm10, %v304_v40 }
 0x130   :  { %v334_v41 = vpop.permute.xlu1 %333  ;;  %v342_v42 = vpop.permute.xlu0 %341 }
 0x131   :  { %336 = vst.msk [vmem:[#allocation2 + $0x20] sm:$0xff] %vm183_vm11, %v334_v41 }
 0x132   :  { %345 = vst.msk [vmem:[#allocation2 + $0x28] sm:$0xff] %vm195_vm12, %v342_v42 }
 0x134   :  { %v148_v43 = vpop.permute.xlu1 %147  ;;  %v186_v44 = vpop.permute.xlu0 %185 }
 0x135   :  { %151 = vst.msk [vmem:[#allocation2] sm:$0xff] %vm150_vm13, %v148_v43 }
 0x136   :  { %189 = vst.msk [vmem:[#allocation2 + $0x8] sm:$0xff] %vm188_vm14, %v186_v44 }
 0x137   :  { %156 = vst.msk [vmem:[#allocation2] sm:$0xff] %vm155_vm15, %v484_v19 }
 0x138   :  { %194 = vst.msk [vmem:[#allocation2 + $0x8] sm:$0xff] %vm193_vm0, %v191_v39  ;;  %v198_v45 = vpop.permute.xlu1 %197  ;;  %v308_v46 = vpop.permute.xlu0 %307 }
 0x139   :  { %201 = vst.msk [vmem:[#allocation2 + $0x10] sm:$0xff] %vm200_vm1, %v198_v45 }
 0x13a   :  { %310 = vst.msk [vmem:[#allocation2 + $0x18] sm:$0xff] %vm150_vm13, %v308_v46 }
 0x13b   :  { %314 = vst.msk [vmem:[#allocation2 + $0x18] sm:$0xff] %vm155_vm15, %v486_v20 }
 0x13c   :  { %v338_v47 = vpop.permute.xlu1 %337  ;;  %v347_v48 = vpop.permute.xlu0 %346 }
 0x13d   :  { %340 = vst.msk [vmem:[#allocation2 + $0x20] sm:$0xff] %vm188_vm14, %v338_v47 }
 0x13e   :  { %349 = vst.msk [vmem:[#allocation2 + $0x28] sm:$0xff] %vm200_vm1, %v347_v48 }
 0x13f   :  { %344 = vst.msk [vmem:[#allocation2 + $0x20] sm:$0xff] %vm193_vm0, %v342_v42 }
 0x140   :  { %v203_v49 = vpop.permute.xlu1 %202  ;;  %v351_v50 = vpop.permute.xlu0 %350 }
 0x141   :  { %206 = vst.msk [vmem:[#allocation2 + $0x10] sm:$0xff] %vm205_vm2, %v203_v49  ;;  %353 = vst.msk [vmem:[#allocation2 + $0x28] sm:$0xff] %vm205_vm2, %v351_v50 }
 0x142   :  { %407 = shalt.err (!%p404_p4)
}
 0x143   :  { %s408_s11 = scalar_lea.hbm %s511_s3, 768 }
 0x144   :  { %p409_p5 = scmp.ne.s32.totalorder %s511_s3, %s408_s11  ;;  %p412_p6 = scmp.lt.u32.totalorder %s408_s11, %s511_s3 }
 0x146   :  { %p414_p7 = pnand %p412_p6, %p409_p5 }
 0x148   :  { %417 = shalt.err (!%p414_p7)
}
 0x149   :  { %s440_s0 = smov 384   ;;  %s441_s1 = smov 24  }
 0x14a   :  { %365 = dma.vmem_to_hbm [thread:$0]  %s360_s7, 768, %s511_s3, [#allocation3], %s440_s0, %s440_s0, %s441_s1  }
 0x14b   :  { %418 = dma.done.wait [#allocation3], 768  }
 0x14c   :  { %419 = vsyncadd [#allocation3], 4294966528 }
 0x14d   :  { %369 = vsyncpa [#allocation3], 1 }

</bundles_post_ra>
